<compile_context>
chip_gen: v5e
topology: v5e:2x2
jax: 0.10.0
libtpu: 0.0.40
codegen_flags: <defaults>
</compile_context>

<pallas_src>
import functools

import numpy as np
import jax
import jax.numpy as jnp
from jax import lax
from jax.experimental import pallas as pl
from jax.experimental.pallas import tpu as pltpu


def _bd_kernel(x_ref, xa_ref, w_ref, out_ref, *, alpha, beta, C):
    """Single invocation: normalize, one NT matmul, masked softplus sum."""
    x = x_ref[...]           # (M, D) f32, M = N*K
    xa = xa_ref[...]

    # F.normalize(p=2, dim=-1): v / max(||v||_2, 1e-12)
    eps = jnp.float32(1e-12)
    xn = x / jnp.maximum(jnp.sqrt(jnp.sum(x * x, axis=-1, keepdims=True)), eps)
    xan = xa / jnp.maximum(jnp.sqrt(jnp.sum(xa * xa, axis=-1, keepdims=True)), eps)

    # sim = xn @ xan.T via an NT contraction (both operands contract the lane
    # axis) -- MXU-native layout, no explicit transpose.
    sim = lax.dot_general(
        xn, xan,
        dimension_numbers=(((1,), (1,)), ((), ())),
        preferred_element_type=jnp.float32)          # (M, M)

    M = sim.shape[0]
    rows = lax.broadcasted_iota(jnp.int32, (M, M), 0)
    cols = lax.broadcasted_iota(jnp.int32, (M, M), 1)
    pos = rows == cols

    cons = jnp.where(pos, jnp.float32(-1.0), jnp.float32(C))
    act = jnp.float32(alpha) * (sim - jnp.float32(beta)) * cons

    # Numerically stable softplus(act) == log(exp(act) + 1); also keeps the
    # weight-0 cross-group entries finite so they contribute exactly zero.
    sp = jnp.maximum(act, jnp.float32(0.0)) + jnp.log(
        jnp.float32(1.0) + jnp.exp(-jnp.abs(act)))

    # w_ref folds norm_mask, per-group weights (1/ng local, lam_glb global)
    # and the zeroing of cross-group pairs -> one masked reduction to scalar.
    out_ref[0] = jnp.sum(sp * w_ref[...])


@functools.partial(jax.jit, static_argnames=("lam_glb", "add_global_group"))
def binomial_deviance_loss(xs, x_augs, lam_glb=0.5, add_global_group=True):
    """JAX/Pallas equivalent of BinomialDevianceLoss.forward(xs, x_augs)."""
    N, K, D = xs.shape
    ng = K - 1 if add_global_group else K
    M = N * K

    # Static combined weight matrix (trace-time numpy, no data dependence):
    #   diag of a group's block        -> w_g / max(1e-5, N)
    #   off-diag within a group block  -> w_g / max(1e-5, N^2 - N)
    #   cross-group entries            -> 0
    # with w_g = 1/ng for local groups and lam_glb for the global group.
    inv_pos = 1.0 / max(1e-5, float(N))
    inv_neg = 1.0 / max(1e-5, float(N * N - N))
    W = np.zeros((M, M), np.float32)
    for k in range(K):
        w_g = (1.0 / ng) if k < ng else float(lam_glb)
        blk = np.full((N, N), inv_neg, np.float32)
        np.fill_diagonal(blk, inv_pos)
        idx = np.arange(N) * K + k        # rows of group k under (N, K) flatten
        W[np.ix_(idx, idx)] = w_g * blk
    W = jnp.asarray(W)

    # (N, K, D) -> (N*K, D): free row-major collapse (no transpose / HBM copy).
    x2 = xs.astype(jnp.float32).reshape(M, D)
    xa2 = x_augs.astype(jnp.float32).reshape(M, D)

    kernel = functools.partial(_bd_kernel, alpha=2.0, beta=0.5, C=25.0)
    out = pl.pallas_call(
        kernel,
        out_shape=jax.ShapeDtypeStruct((1,), jnp.float32),
        in_specs=[
            pl.BlockSpec(memory_space=pltpu.VMEM),
            pl.BlockSpec(memory_space=pltpu.VMEM),
            pl.BlockSpec(memory_space=pltpu.VMEM),
        ],
        out_specs=pl.BlockSpec(memory_space=pltpu.SMEM),
    )(x2, xa2, W)
    # TODO(synk): at production sizes (large N*K) switch to a K-tile grid over
    # the diagonal blocks instead of the full (N*K)^2 similarity matrix, and
    # re-derive tiles for v7x's smaller VMEM budget.
    return out[0]


def _reference_loss(xs, x_augs, lam_glb, add_global_group):
    """Pure-JAX mirror of the PyTorch forward, for correctness checking."""
    def normalize(v):
        n = jnp.sqrt(jnp.sum(v * v, axis=-1, keepdims=True))
        return v / jnp.maximum(n, 1e-12)

    xs = normalize(xs.astype(jnp.float32))
    x_augs = normalize(x_augs.astype(jnp.float32))
    N, K, _ = xs.shape

    def bd(x, xa):
        sim = x @ xa.T
        eye = jnp.eye(N, dtype=jnp.float32)
        neg = 1.0 - eye
        cons = -1.0 * eye + 25.0 * neg
        act = 2.0 * (sim - 0.5) * cons
        nm = eye / jnp.maximum(1e-5, jnp.sum(eye)) + neg / jnp.maximum(1e-5, jnp.sum(neg))
        return jnp.sum(jnp.log(jnp.exp(act) + 1.0) * nm)

    ng = K - 1 if add_global_group else K
    loss = sum(bd(xs[:, i, :], x_augs[:, i, :]) for i in range(ng)) / jnp.float32(ng)
    if add_global_group:
        loss = loss + jnp.float32(lam_glb) * bd(xs[:, -1, :], x_augs[:, -1, :])
    return loss


if __name__ == "__main__":
    # "args" of the module, fixed deterministically in-script
    LAM_GLB = 0.5
    ADD_GLOBAL_GROUP = True

    # small shapes: N graphs, K groups (last one = global group), D features
    N, K, D = 8, 4, 32
    key = jax.random.PRNGKey(0)
    k1, k2 = jax.random.split(key)
    xs = jax.random.normal(k1, (N, K, D), dtype=jnp.float32)
    x_augs = jax.random.normal(k2, (N, K, D), dtype=jnp.float32)

    loss = binomial_deviance_loss(xs, x_augs, lam_glb=LAM_GLB,
                                  add_global_group=ADD_GLOBAL_GROUP)
    loss = jax.block_until_ready(loss)

    ref = jax.block_until_ready(
        _reference_loss(xs, x_augs, LAM_GLB, ADD_GLOBAL_GROUP))
    assert jnp.allclose(loss, ref, rtol=1e-4, atol=1e-5), (loss, ref)

    print("KERNEL_OK")
</pallas_src>

<mosaic_0001>
module attributes {stable_mosaic.version = 11 : i64} {
  func.func @_bd_kernel(%arg0: memref<32x32xf32, #tpu.memory_space<vmem>>, %arg1: memref<32x32xf32, #tpu.memory_space<vmem>>, %arg2: memref<32x32xf32, #tpu.memory_space<vmem>>, %arg3: memref<1xf32, #tpu.memory_space<smem>>) attributes {dimension_semantics = [], scalar_prefetch = 0 : i64, scratch_operands = 0 : i64, tpu.core_type = #tpu.core_type<tc>} {
    %c0 = arith.constant 0 : index
    %c0_0 = arith.constant 0 : index
    %0 = vector.load %arg0[%c0, %c0_0] : memref<32x32xf32, #tpu.memory_space<vmem>>, vector<32x32xf32>
    %c0_1 = arith.constant 0 : index
    %c0_2 = arith.constant 0 : index
    %1 = vector.load %arg1[%c0_1, %c0_2] : memref<32x32xf32, #tpu.memory_space<vmem>>, vector<32x32xf32>
    %2 = arith.mulf %0, %0 : vector<32x32xf32>
    %cst = arith.constant dense<0.000000e+00> : vector<32xf32>
    %3 = vector.multi_reduction <add>, %2, %cst [1] : vector<32x32xf32> to vector<32xf32>
    %4 = vector.shape_cast %3 : vector<32xf32> to vector<32x1xf32>
    %5 = math.sqrt %4 : vector<32x1xf32>
    %cst_3 = arith.constant 9.99999996E-13 : f32
    %6 = vector.broadcast %cst_3 : f32 to vector<32x1xf32>
    %7 = arith.maximumf %5, %6 : vector<32x1xf32>
    %8 = vector.broadcast %7 : vector<32x1xf32> to vector<32x32xf32>
    %9 = arith.divf %0, %8 : vector<32x32xf32>
    %10 = arith.mulf %1, %1 : vector<32x32xf32>
    %cst_4 = arith.constant dense<0.000000e+00> : vector<32xf32>
    %11 = vector.multi_reduction <add>, %10, %cst_4 [1] : vector<32x32xf32> to vector<32xf32>
    %12 = vector.shape_cast %11 : vector<32xf32> to vector<32x1xf32>
    %13 = math.sqrt %12 : vector<32x1xf32>
    %cst_5 = arith.constant 9.99999996E-13 : f32
    %14 = vector.broadcast %cst_5 : f32 to vector<32x1xf32>
    %15 = arith.maximumf %13, %14 : vector<32x1xf32>
    %16 = vector.broadcast %15 : vector<32x1xf32> to vector<32x32xf32>
    %17 = arith.divf %1, %16 : vector<32x32xf32>
    %cst_6 = arith.constant dense<0.000000e+00> : vector<32x32xf32>
    %18 = tpu.matmul %9, %17, %cst_6 {dimension_numbers = #tpu.dot_dimension_numbers<[1], [1], [0], [0], [0, 0, 1, 0], [], []>} : vector<32x32xf32>, vector<32x32xf32>, vector<32x32xf32> -> vector<32x32xf32>
    %19 = tpu.iota {dimensions = array<i32: 0>} : vector<32x32xi32>
    %20 = tpu.iota {dimensions = array<i32: 1>} : vector<32x32xi32>
    %21 = arith.cmpi eq, %19, %20 : vector<32x32xi32>
    %cst_7 = arith.constant -1.000000e+00 : f32
    %cst_8 = arith.constant 2.500000e+01 : f32
    %22 = vector.broadcast %cst_7 : f32 to vector<32x32xf32>
    %23 = vector.broadcast %cst_8 : f32 to vector<32x32xf32>
    %24 = arith.select %21, %22, %23 : vector<32x32xi1>, vector<32x32xf32>
    %cst_9 = arith.constant 5.000000e-01 : f32
    %25 = vector.broadcast %cst_9 : f32 to vector<32x32xf32>
    %26 = arith.subf %18, %25 : vector<32x32xf32>
    %cst_10 = arith.constant 2.000000e+00 : f32
    %27 = vector.broadcast %cst_10 : f32 to vector<32x32xf32>
    %28 = arith.mulf %27, %26 : vector<32x32xf32>
    %29 = arith.mulf %28, %24 : vector<32x32xf32>
    %cst_11 = arith.constant 0.000000e+00 : f32
    %30 = vector.broadcast %cst_11 : f32 to vector<32x32xf32>
    %31 = arith.maximumf %29, %30 : vector<32x32xf32>
    %32 = math.absf %29 : vector<32x32xf32>
    %cst_12 = arith.constant 0.000000e+00 : f32
    %33 = vector.broadcast %cst_12 : f32 to vector<32x32xf32>
    %34 = arith.subf %33, %32 : vector<32x32xf32>
    %35 = math.exp %34 : vector<32x32xf32>
    %cst_13 = arith.constant 1.000000e+00 : f32
    %36 = vector.broadcast %cst_13 : f32 to vector<32x32xf32>
    %37 = arith.addf %36, %35 : vector<32x32xf32>
    %38 = math.log %37 : vector<32x32xf32>
    %39 = arith.addf %31, %38 : vector<32x32xf32>
    %c0_14 = arith.constant 0 : index
    %c0_15 = arith.constant 0 : index
    %40 = vector.load %arg2[%c0_14, %c0_15] : memref<32x32xf32, #tpu.memory_space<vmem>>, vector<32x32xf32>
    %41 = arith.mulf %39, %40 : vector<32x32xf32>
    %42 = vector.shape_cast %41 : vector<32x32xf32> to vector<1x32x32xf32>
    %cst_16 = arith.constant dense<0.000000e+00> : vector<1xf32>
    %43 = vector.multi_reduction <add>, %42, %cst_16 [1, 2] : vector<1x32x32xf32> to vector<1xf32>
    %44 = vector.shape_cast %43 : vector<1xf32> to vector<1x1x1xf32>
    %45 = vector.extract %44[0, 0, 0] : f32 from vector<1x1x1xf32>
    %c0_17 = arith.constant 0 : index
    %46 = memref.load %arg3[%c0_17] : memref<1xf32, #tpu.memory_space<smem>>
    memref.store %45, %arg3[%c0_17] : memref<1xf32, #tpu.memory_space<smem>>
    return
  }
}

</mosaic_0001>

<bundles_post_ra>
// kernel: binomial_deviance_loss.1
= control target key start
LH: loop header
LB: loop body
LE: loop exit
PB: predicated region body
PF: predicated region fallthrough
CT: control target
= control target key end

     0   :  { %8 = vsyncpa [#allocation3], 0  ;;  %s972_s0 = inlined_call_operand.hbm [shape: f32[32,32], index: 0, kind: input, shape index: {}]   ;;  %s973_s1 = inlined_call_operand.hbm [shape: f32[32,32], index: 1, kind: input, shape index: {}]   ;;  %s974_s2 = inlined_call_operand.hbm [shape: f32[32,32], index: 2, kind: input, shape index: {}]   ;;  %s975_s3 = inlined_call_operand.hbm [shape: f32[1], index: 3, kind: output, shape index: {}]  }
   0x1   :  { %9 = vsyncpa [#allocation6], 0 }
   0x2   :  { %10 = vsyncpa [#allocation4], 0  ;;  %s28_s14 = sshll.u32 %s973_s1, 4  ;;  %s657_s15 = smov [#allocation5]   ;;  %s29_s14 = int_to_ptr.hbm [resolvable:$true] %s28_s14 }
   0x3   :  { %s30_s16 = sshll.u32 %s657_s15, 4  ;;  %s15_s19 = sshll.u32 %s972_s0, 4  ;;  %s31_s16 = int_to_ptr.vmem [resolvable:$true] %s30_s16  ;;  %s16_s19 = int_to_ptr.hbm [resolvable:$true] %s15_s19 }
   0x4   :  { %s658_s20 = smov 128   ;;  %s659_s21 = smov 8  }
   0x5   :  { %36 = dma.hbm_to_vmem [thread:$0]  %s29_s14, 512, %s31_s16, [#allocation6], %s658_s20, %s658_s20, %s659_s21  }
   0x6   :  { %s660_s22 = smov [#allocation2]   ;;  %s41_s26 = sshll.u32 %s974_s2, 4  ;;  %s42_s26 = int_to_ptr.hbm [resolvable:$true] %s41_s26 }
   0x7   :  { %s17_s23 = sshll.u32 %s660_s22, 4  ;;  %s661_s1 = smov [#allocation7]   ;;  %s18_s23 = int_to_ptr.vmem [resolvable:$true] %s17_s23 }
   0x8   :  { %23 = dma.hbm_to_vmem [thread:$0]  %s16_s19, 512, %s18_s23, [#allocation3], %s658_s20, %s658_s20, %s659_s21  }
   0x9   :  { %s43_s27 = sshll.u32 %s661_s1, 4  ;;  %s44_s27 = int_to_ptr.vmem [resolvable:$true] %s43_s27 }
   0xa   :  { %49 = dma.hbm_to_vmem [thread:$0]  %s42_s26, 512, %s44_s27, [#allocation6], %s658_s20, %s658_s20, %s659_s21  }
   0xb   :  { %651 = dma.done.wait [#allocation3], 512  }
   0xc   :  { %652 = vsyncadd [#allocation3], 4294966784 }
   0xd   :  { %653 = dma.done.wait [#allocation6], 1024  }
   0xe   :  { %654 = vsyncadd [#allocation6], 4294966272  ;;  %v693_v0 = vld [vmem:[#allocation5 + $0x18] sm:$0xff]  ;;  %vm74_vm0 = vcmask 261120   ;;  %v695_v1 = vld [vmem:[#allocation5 + $0x8] sm:$0xff]  ;;  %s474_s28 = sshll.u32 %s975_s3, 4  ;;  %s475_s28 = int_to_ptr.hbm [resolvable:$true] %s474_s28 }
   0xf   :  { %v697_v2 = vld [vmem:[#allocation2 + $0x10] sm:$0xff]  ;;  %v202_v3 = vmul.f32 %v693_v0, %v693_v0  ;;  %v200_v4 = vmul.f32 %v695_v1, %v695_v1  ;;  %v707_v7 = vld [vmem:[#allocation5] sm:$0xff]  ;;  %v712_v11 = vld [vmem:[#allocation2 + $0x18] sm:$0xff]  ;;  %s663_s30 = smov [#allocation8]  }
  0x10   :  { %v72_v5 = vmul.f32 %v697_v2, %v697_v2  ;;  %v705_v6 = vld [vmem:[#allocation5 + $0x10] sm:$0xff]  ;;  %v199_v13 = vmul.f32 %v707_v7, %v707_v7  ;;  %v73_v14 = vmul.f32 %v712_v11, %v712_v11  ;;  %v723_v18 = vld [vmem:[#allocation2 + $0x8] sm:$0xff]  ;;  %v725_v19 = vld [vmem:[#allocation2] sm:$0xff] }
  0x11   :  { %v212_v8 = vsel %vm74_vm0, %v202_v3, 0.0  ;;  %v206_v9 = vsel %vm74_vm0, %v200_v4, 0.0  ;;  %v201_v12 = vmul.f32 %v705_v6, %v705_v6  ;;  %v71_v20 = vmul.f32 %v723_v18, %v723_v18 }
  0x12   :  { %v81_v10 = vsel %vm74_vm0, %v72_v5, 0.0  ;;  %213 = vadd.xlane.f32.xlu0 %v212_v8  ;;  %207 = vadd.xlane.f32.xlu1 %v206_v9  ;;  %v203_v16 = vsel %vm74_vm0, %v199_v13, 0.0  ;;  %v84_v17 = vsel %vm74_vm0, %v73_v14, 0.0  ;;  %v70_v21 = vmul.f32 %v725_v19, %v725_v19 }
  0x13   :  { %82 = vadd.xlane.f32.xlu2 %v81_v10  ;;  %v209_v15 = vsel %vm74_vm0, %v201_v12, 0.0  ;;  %v78_v22 = vsel %vm74_vm0, %v71_v20, 0.0 }
  0x14   :  { %v75_v23 = vsel %vm74_vm0, %v70_v21, 0.0 }
  0x1a   :  { %210 = vadd.xlane.f32.xlu0 %v209_v15  ;;  %204 = vadd.xlane.f32.xlu1 %v203_v16 }
  0x1b   :  { %85 = vadd.xlane.f32.xlu2 %v84_v17 }
  0x22   :  { %79 = vadd.xlane.f32.xlu1 %v78_v22  ;;  %76 = vadd.xlane.f32.xlu0 %v75_v23 }
  0x85   :  { %v214_v24 = vpop.xlane.xlu0 %213  ;;  %v733_v25 = vpop.xlane.xlu1 %207 }
  0x86   :  { %519 = vrsqrt.f32 %v214_v24  ;;  %v735_v26 = vpop.xlane.xlu2 %82  ;;  %vm258_vm1 = vcmp.eq.f32.partialorder %v214_v24, inf  ;;  %vm260_vm2 = vcmp.eq.f32.partialorder %v214_v24, 0.0  ;;  %v261_v42 = vand.u32 2147483648, %v214_v24 }
  0x87   :  { %521 = vrsqrt.f32 %v733_v25  ;;  %vm234_vm3 = vcmp.eq.f32.partialorder %v733_v25, inf  ;;  %vm236_vm4 = vcmp.eq.f32.partialorder %v733_v25, 0.0  ;;  %v237_v46 = vand.u32 2147483648, %v733_v25 }
  0x88   :  { %523 = vrsqrt.f32 %v735_v26  ;;  %vm118_vm5 = vcmp.eq.f32.partialorder %v735_v26, inf  ;;  %vm120_vm6 = vcmp.eq.f32.partialorder %v735_v26, 0.0  ;;  %v121_v58 = vand.u32 2147483648, %v735_v26 }
  0x8c   :  { %v520_v27 = vpop.eup %519 }
  0x8d   :  { %v522_v28 = vpop.eup %521  ;;  %v252_v29 = vmul.f32 %v520_v27, %v214_v24  ;;  %v739_v30 = vpop.xlane.xlu0 %210 }
  0x8e   :  { %v741_v31 = vpop.xlane.xlu1 %204  ;;  %v524_v32 = vpop.eup %523  ;;  %v228_v33 = vmul.f32 %v522_v28, %v733_v25  ;;  %525 = vrsqrt.f32 %v739_v30  ;;  %vm246_vm7 = vcmp.eq.f32.partialorder %v739_v30, inf  ;;  %v249_v61 = vand.u32 2147483648, %v739_v30 }
  0x8f   :  { %v745_v34 = vpop.xlane.xlu2 %85  ;;  %v253_v35 = vmul.f32 %v520_v27, %v252_v29  ;;  %v112_v36 = vmul.f32 %v524_v32, %v735_v26  ;;  %527 = vrsqrt.f32 %v741_v31  ;;  %vm248_vm8 = vcmp.eq.f32.partialorder %v739_v30, 0.0 }
  0x90   :  { %v229_v37 = vmul.f32 %v522_v28, %v228_v33  ;;  %529 = vrsqrt.f32 %v745_v34  ;;  %vm222_vm9 = vcmp.eq.f32.partialorder %v741_v31, inf  ;;  %vm224_vm10 = vcmp.eq.f32.partialorder %v741_v31, 0.0 }
  0x91   :  { %v254_v38 = vmul.f32 0.5, %v253_v35  ;;  %v113_v39 = vmul.f32 %v524_v32, %v112_v36  ;;  %vm130_vm11 = vcmp.eq.f32.partialorder %v745_v34, inf  ;;  %vm132_vm12 = vcmp.eq.f32.partialorder %v745_v34, 0.0 }
  0x92   :  { %v230_v40 = vmul.f32 0.5, %v229_v37  ;;  %v133_v35 = vand.u32 2147483648, %v745_v34 }
  0x93   :  { %v255_v41 = vsub.f32 1.5, %v254_v38  ;;  %v114_v43 = vmul.f32 0.5, %v113_v39 }
  0x94   :  { %v526_v44 = vpop.eup %525  ;;  %v231_v45 = vsub.f32 1.5, %v230_v40 }
  0x95   :  { %v528_v47 = vpop.eup %527  ;;  %v256_v48 = vmul.f32 %v520_v27, %v255_v41  ;;  %v115_v49 = vsub.f32 1.5, %v114_v43  ;;  %v240_v50 = vmul.f32 %v526_v44, %v739_v30  ;;  %v760_v54 = vpop.xlane.xlu0 %76 }
  0x96   :  { %v755_v51 = vpop.xlane.xlu1 %79  ;;  %v232_v52 = vmul.f32 %v522_v28, %v231_v45  ;;  %v216_v53 = vmul.f32 %v528_v47, %v741_v31  ;;  %v530_v55 = vpop.eup %529  ;;  %vm94_vm15 = vcmp.eq.f32.partialorder %v760_v54, inf }
  0x97   :  { %531 = vrsqrt.f32 %v755_v51  ;;  %v257_v56 = vmul.f32 %v256_v48, %v214_v24  ;;  %v116_v57 = vmul.f32 %v524_v32, %v115_v49  ;;  %v241_v59 = vmul.f32 %v526_v44, %v240_v50 }
  0x98   :  { %v233_v60 = vmul.f32 %v232_v52, %v733_v25  ;;  %v217_v62 = vmul.f32 %v528_v47, %v216_v53  ;;  %v124_v63 = vmul.f32 %v530_v55, %v745_v34  ;;  %533 = vrsqrt.f32 %v760_v54 }
  0x99   :  { %v259_v3 = vsel %vm258_vm1, %v214_v24, %v257_v56  ;;  %v117_v4 = vmul.f32 %v116_v57, %v735_v26  ;;  %v242_v5 = vmul.f32 0.5, %v241_v59  ;;  %v225_v24 = vand.u32 2147483648, %v741_v31 }
  0x9a   :  { %v262_v8 = vsel %vm260_vm2, %v261_v42, %v259_v3  ;;  %v235_v9 = vsel %vm234_vm3, %v733_v25, %v233_v60  ;;  %v218_v10 = vmul.f32 0.5, %v217_v62  ;;  %v125_v12 = vmul.f32 %v530_v55, %v124_v63 }
  0x9b   :  { %v776_v13 = vmax.f32 %v262_v8, 1e-12  ;;  %v238_v14 = vsel %vm236_vm4, %v237_v46, %v235_v9  ;;  %v119_v15 = vsel %vm118_vm5, %v735_v26, %v117_v4  ;;  %v243_v16 = vsub.f32 1.5, %v242_v5 }
  0x9c   :  { %v783_v20 = vmax.f32 %v238_v14, 1e-12  ;;  %v219_v21 = vsub.f32 1.5, %v218_v10  ;;  %v126_v22 = vmul.f32 0.5, %v125_v12  ;;  %v122_v27 = vsel %vm120_vm6, %v121_v58, %v119_v15 }
  0x9d   :  { %v532_v17 = vpop.eup %531  ;;  %535 = vrcp.f32 %v776_v13  ;;  %v244_v23 = vmul.f32 %v526_v44, %v243_v16  ;;  %vm106_vm13 = vcmp.eq.f32.partialorder %v755_v51, inf  ;;  %v799_v39 = vmax.f32 %v122_v27, 1e-12 }
  0x9e   :  { %v100_v25 = vmul.f32 %v532_v17, %v755_v51  ;;  %v220_v28 = vmul.f32 %v528_v47, %v219_v21  ;;  %v127_v29 = vsub.f32 1.5, %v126_v22  ;;  %v534_v32 = vpop.eup %533  ;;  %537 = vrcp.f32 %v783_v20 }
  0x9f   :  { %v245_v33 = vmul.f32 %v244_v23, %v739_v30  ;;  %v88_v26 = vmul.f32 %v534_v32, %v760_v54  ;;  %vm108_vm14 = vcmp.eq.f32.partialorder %v755_v51, 0.0  ;;  %v109_v42 = vand.u32 2147483648, %v755_v51 }
  0xa0   :  { %v101_v36 = vmul.f32 %v532_v17, %v100_v25  ;;  %v221_v37 = vmul.f32 %v220_v28, %v741_v31  ;;  %v128_v38 = vmul.f32 %v530_v55, %v127_v29  ;;  %vm96_vm1 = vcmp.eq.f32.partialorder %v760_v54, 0.0 }
  0xa1   :  { %v247_v40 = vsel %vm246_vm7, %v739_v30, %v245_v33  ;;  %v89_v46 = vmul.f32 %v534_v32, %v88_v26  ;;  %v97_v3 = vand.u32 2147483648, %v760_v54  ;;  %vm317_vm3 = vweird.f32 %v776_v13 }
  0xa2   :  { %v102_v41 = vmul.f32 0.5, %v101_v36  ;;  %v250_v43 = vsel %vm248_vm8, %v249_v61, %v247_v40  ;;  %v223_v44 = vsel %vm222_vm9, %v741_v31, %v221_v37  ;;  %v129_v45 = vmul.f32 %v128_v38, %v745_v34 }
  0xa3   :  { %v536_v47 = vpop.eup %535  ;;  %v812_v48 = vmax.f32 %v250_v43, 1e-12  ;;  %v226_v49 = vsel %vm224_vm10, %v225_v24, %v223_v44  ;;  %v90_v53 = vmul.f32 0.5, %v89_v46  ;;  %v321_v31 = vand.u32 2147483647, %v776_v13 }
  0xa4   :  { %v103_v50 = vsub.f32 1.5, %v102_v41  ;;  %v817_v52 = vmax.f32 %v226_v49, 1e-12  ;;  %v131_v30 = vsel %vm130_vm11, %v745_v34, %v129_v45  ;;  %v313_v55 = vmul.f32 %v536_v47, %v776_v13  ;;  %v827_v58 = vpop.eup %537 }
  0xa5   :  { %539 = vrcp.f32 %v812_v48  ;;  %v134_v56 = vsel %vm132_vm12, %v133_v35, %v131_v30  ;;  %v91_v60 = vsub.f32 1.5, %v90_v53  ;;  %v323_v34 = vand.u32 2147483648, %v776_v13 }
  0xa6   :  { %v104_v57 = vmul.f32 %v532_v17, %v103_v50  ;;  %541 = vrcp.f32 %v817_v52  ;;  %v830_v59 = vmax.f32 %v134_v56, 1e-12  ;;  %v314_v61 = vsub.f32 1.0, %v313_v55 }
  0xa7   :  { %543 = vrcp.f32 %v799_v39  ;;  %v92_v63 = vmul.f32 %v534_v32, %v91_v60  ;;  %vm318_vm2 = vweird.f32 %v536_v47  ;;  %vm841_vm4 = vcmp.eq.f32.partialorder %v321_v31, 8.507059e+37 }
  0xa8   :  { %v105_v62 = vmul.f32 %v104_v57, %v755_v51  ;;  %v315_v4 = vmul.f32 %v536_v47, %v314_v61  ;;  %v283_v9 = vmul.f32 %v827_v58, %v783_v20  ;;  %545 = vrcp.f32 %v830_v59  ;;  %vm319_vm6 = vmor %vm317_vm3, %vm318_vm2 }
  0xa9   :  { %v93_v12 = vmul.f32 %v92_v63, %v760_v54  ;;  %vm302_vm5 = vweird.f32 %v812_v48  ;;  %v324_v13 = vor.u32 1.1754944e-38, %v323_v34  ;;  %v308_v17 = vand.u32 2147483648, %v812_v48 }
  0xaa   :  { %v107_v5 = vsel %vm106_vm13, %v755_v51, %v105_v62  ;;  %v316_v14 = vadd.f32 %v536_v47, %v315_v4  ;;  %v284_v21 = vsub.f32 1.0, %v283_v9  ;;  %vm288_vm7 = vweird.f32 %v827_v58 }
  0xab   :  { %v110_v10 = vsel %vm108_vm14, %v109_v42, %v107_v5  ;;  %v540_v15 = vpop.eup %539  ;;  %v95_v51 = vsel %vm94_vm15, %v760_v54, %v93_v12  ;;  %v291_v36 = vand.u32 2147483647, %v783_v20  ;;  %vm287_vm8 = vweird.f32 %v783_v20 }
  0xac   :  { %v852_v16 = vmax.f32 %v110_v10, 1e-12  ;;  %v855_v22 = vpop.eup %541  ;;  %v320_v23 = vsel %vm319_vm6, %v536_v47, %v316_v14  ;;  %v298_v24 = vmul.f32 %v540_v15, %v812_v48  ;;  %v98_v27 = vsel %vm96_vm1, %v97_v3, %v95_v51  ;;  %vm289_vm10 = vmor %vm287_vm8, %vm288_vm7 }
  0xad   :  { %v862_v25 = vpop.eup %543  ;;  %v325_v28 = vsel %vm841_vm4, %v324_v13, %v320_v23  ;;  %v285_v29 = vmul.f32 %v827_v58, %v284_v21  ;;  %v870_v32 = vmax.f32 %v98_v27, 1e-12  ;;  %v293_v38 = vand.u32 2147483648, %v783_v20 }
  0xae   :  { %547 = vrcp.f32 %v852_v16  ;;  %v326_v33 = vmul.f32 %v325_v28, %v693_v0  ;;  %v299_v35 = vsub.f32 1.0, %v298_v24  ;;  %v268_v54 = vmul.f32 %v855_v22, %v817_v52  ;;  %v879_v26 = vpop.eup %545 }
  0xaf   :  { %v286_v37 = vadd.f32 %v827_v58, %v285_v29  ;;  %549 = vrcp.f32 %v870_v32  ;;  %vm303_vm9 = vweird.f32 %v540_v15  ;;  %v306_v40 = vand.u32 2147483647, %v812_v48 }
  0xb0   :  { %486 = vmatpush.xpose.msk.msra.mxu0 %vm74_vm0, %v326_v33  ;;  %498 = vmatpush.xpose.msk.msra.mxu1 %vm74_vm0, %v326_v33  ;;  %v300_v0 = vmul.f32 %v540_v15, %v299_v35  ;;  %v294_v41 = vor.u32 1.1754944e-38, %v293_v38  ;;  %v269_v42 = vsub.f32 1.0, %v268_v54  ;;  %v276_v43 = vand.u32 2147483647, %v817_v52  ;;  %vm304_vm12 = vmor %vm302_vm5, %vm303_vm9 }
  0xb1   :  { %499 = vmatpush.xpose.msk.msra.mxu2 %vm74_vm0, %v326_v33  ;;  %500 = vmatpush.xpose.msk.msra.mxu3 %vm74_vm0, %v326_v33  ;;  %v290_v20 = vsel %vm289_vm10, %v827_v58, %v286_v37  ;;  %v309_v45 = vor.u32 1.1754944e-38, %v308_v17  ;;  %vm292_vm11 = vcmp.eq.f32.partialorder %v291_v36, 8.507059e+37  ;;  %v278_v46 = vand.u32 2147483648, %v817_v52 }
  0xb2   :  { %v301_v44 = vadd.f32 %v540_v15, %v300_v0  ;;  %v295_v49 = vsel %vm292_vm11, %v294_v41, %v290_v20  ;;  %v270_v50 = vmul.f32 %v855_v22, %v269_v42  ;;  %vm273_vm13 = vweird.f32 %v855_v22 }
  0xb3   :  { %v148_v30 = vand.u32 2147483647, %v870_v32  ;;  %vm307_vm14 = vcmp.eq.f32.partialorder %v306_v40, 8.507059e+37  ;;  %vm272_vm15 = vweird.f32 %v817_v52  ;;  %v150_v55 = vand.u32 2147483648, %v870_v32 }
  0xb4   :  { %v548_v47 = vpop.eup %547  ;;  %v305_v53 = vsel %vm304_vm12, %v540_v15, %v301_v44  ;;  %v271_v57 = vadd.f32 %v855_v22, %v270_v50  ;;  %vm277_vm1 = vcmp.eq.f32.partialorder %v276_v43, 8.507059e+37  ;;  %vm144_vm2 = vweird.f32 %v870_v32  ;;  %vm274_vm3 = vmor %vm272_vm15, %vm273_vm13 }
  0xb5   :  { %v310_v56 = vsel %vm307_vm14, %v309_v45, %v305_v53  ;;  %v155_v48 = vmul.f32 %v548_v47, %v852_v16  ;;  %v550_v31 = vpop.eup %549  ;;  %v296_v60 = vmul.f32 %v295_v49, %v695_v1  ;;  %v279_v61 = vor.u32 1.1754944e-38, %v278_v46 }
  0xb6   :  { %v311_v58 = vmul.f32 %v310_v56, %v705_v6  ;;  %v163_v62 = vand.u32 2147483647, %v852_v16  ;;  %v275_v52 = vsel %vm274_vm3, %v855_v22, %v271_v57  ;;  %v140_v34 = vmul.f32 %v550_v31, %v870_v32 }
  0xb7   :  { %vm907_vm4 = vcmp.eq.f32.partialorder %v148_v30, 8.507059e+37  ;;  %v156_v3 = vsub.f32 1.0, %v155_v48  ;;  %v280_v6 = vsel %vm277_vm1, %v279_v61, %v275_v52  ;;  %v151_v4 = vor.u32 1.1754944e-38, %v150_v55 }
  0xb8   :  { %487 = vmatpush.xpose.msk.msra.mxu0 %vm74_vm0, %v311_v58  ;;  %501 = vmatpush.xpose.msk.msra.mxu1 %vm74_vm0, %v311_v58  ;;  %v165_v1 = vand.u32 2147483648, %v852_v16  ;;  %v170_v5 = vmul.f32 %v862_v25, %v799_v39  ;;  %v141_v8 = vsub.f32 1.0, %v140_v34  ;;  %vm159_vm5 = vweird.f32 %v852_v16 }
  0xb9   :  { %502 = vmatpush.xpose.msk.msra.mxu2 %vm74_vm0, %v311_v58  ;;  %503 = vmatpush.xpose.msk.msra.mxu3 %vm74_vm0, %v311_v58  ;;  %v157_v9 = vmul.f32 %v548_v47, %v156_v3  ;;  %vm160_vm6 = vweird.f32 %v548_v47  ;;  %v281_v10 = vmul.f32 %v280_v6, %v707_v7  ;;  %vm145_vm7 = vweird.f32 %v550_v31 }
  0xba   :  { %vm920_vm8 = vcmp.eq.f32.partialorder %v163_v62, 8.507059e+37  ;;  %v171_v14 = vsub.f32 1.0, %v170_v5  ;;  %v142_v15 = vmul.f32 %v550_v31, %v141_v8  ;;  %v180_v17 = vand.u32 2147483648, %v799_v39  ;;  %vm161_vm9 = vmor %vm159_vm5, %vm160_vm6 }
  0xbb   :  { %v158_v13 = vadd.f32 %v548_v47, %v157_v9  ;;  %v185_v21 = vmul.f32 %v879_v26, %v830_v59  ;;  %v166_v16 = vor.u32 1.1754944e-38, %v165_v1  ;;  %vm175_vm10 = vweird.f32 %v862_v25  ;;  %vm146_vm12 = vmor %vm144_vm2, %vm145_vm7 }
  0xbc   :  { %488 = vmatpush.xpose.msk.msra.mxu0 %vm74_vm0, %v296_v60  ;;  %504 = vmatpush.xpose.msk.msra.mxu1 %vm74_vm0, %v296_v60  ;;  %v172_v7 = vmul.f32 %v862_v25, %v171_v14  ;;  %v178_v22 = vand.u32 2147483647, %v799_v39  ;;  %v143_v51 = vadd.f32 %v550_v31, %v142_v15  ;;  %vm174_vm11 = vweird.f32 %v799_v39 }
  0xbd   :  { %505 = vmatpush.xpose.msk.msra.mxu2 %vm74_vm0, %v296_v60  ;;  %506 = vmatpush.xpose.msk.msra.mxu3 %vm74_vm0, %v296_v60  ;;  %v162_v23 = vsel %vm161_vm9, %v548_v47, %v158_v13  ;;  %v186_v24 = vsub.f32 1.0, %v185_v21  ;;  %vm190_vm13 = vweird.f32 %v879_v26  ;;  %v195_v29 = vand.u32 2147483648, %v830_v59  ;;  %vm176_vm14 = vmor %vm174_vm11, %vm175_vm10 }
  0xbe   :  { %v167_v27 = vsel %vm920_vm8, %v166_v16, %v162_v23  ;;  %v173_v28 = vadd.f32 %v862_v25, %v172_v7  ;;  %v147_v33 = vsel %vm146_vm12, %v550_v31, %v143_v51  ;;  %v181_v35 = vor.u32 1.1754944e-38, %v180_v17 }
  0xbf   :  { %v187_v36 = vmul.f32 %v879_v26, %v186_v24  ;;  %v193_v39 = vand.u32 2147483647, %v830_v59  ;;  %v152_v32 = vsel %vm907_vm4, %v151_v4, %v147_v33  ;;  %v168_v37 = vmul.f32 %v167_v27, %v723_v18 }
  0xc0   :  { %489 = vmatpush.xpose.msk.msra.mxu0 %vm74_vm0, %v281_v10  ;;  %507 = vmatpush.xpose.msk.msra.mxu1 %vm74_vm0, %v281_v10  ;;  %v177_v38 = vsel %vm176_vm14, %v862_v25, %v173_v28  ;;  %vm179_vm15 = vcmp.eq.f32.partialorder %v178_v22, 8.507059e+37  ;;  %v153_v54 = vmul.f32 %v152_v32, %v725_v19  ;;  %vm189_vm1 = vweird.f32 %v830_v59  ;;  %v443_v32 = vld [vmem:[#allocation7] sm:$0xff] }
  0xc1   :  { %508 = vmatpush.xpose.msk.msra.mxu2 %vm74_vm0, %v281_v10  ;;  %509 = vmatpush.xpose.msk.msra.mxu3 %vm74_vm0, %v281_v10  ;;  %v182_v0 = vsel %vm179_vm15, %v181_v35, %v177_v38  ;;  %v188_v40 = vadd.f32 %v879_v26, %v187_v36  ;;  %vm191_vm2 = vmor %vm189_vm1, %vm190_vm13  ;;  %v196_v18 = vor.u32 1.1754944e-38, %v195_v29  ;;  %vm194_vm3 = vcmp.eq.f32.partialorder %v193_v39, 8.507059e+37 }
  0xc2   :  { %v183_v20 = vmul.f32 %v182_v0, %v697_v2  ;;  %v380_v59 = vlaneseq  ;;  %v662_v49 = vmov 25.0  }
  0xc3   :  { %490 = vmatmul.msk.f32.vlgmr.msra.gmra.mxu0 %vm74_vm0, %v153_v54  ;;  %491 = vmatmul.msk.f32.vlgmr.msra.gmra.mxu1 %vm74_vm0, %v168_v37  ;;  %v192_v25 = vsel %vm191_vm2, %v879_v26, %v188_v40  ;;  %v444_v37 = vld [vmem:[#allocation7 + $0x8] sm:$0xff] }
  0xc4   :  { %492 = vmatmul.msk.f32.vlgmr.msra.gmra.mxu2 %vm74_vm0, %v183_v20  ;;  %v197_v19 = vsel %vm194_vm3, %v196_v18, %v192_v25  ;;  %v381_v2 = vshrl.u32 %v380_v59, 7  ;;  %v386_v42 = vand.u32 127, %v380_v59 }
  0xc5   :  { %v198_v41 = vmul.f32 %v197_v19, %v712_v11  ;;  %v445_v19 = vld [vmem:[#allocation7 + $0x10] sm:$0xff] }
  0xc6   :  { %vm387_vm4 = vcmp.eq.s32.totalorder %v381_v2, %v386_v42  ;;  %v382_v43 = vadd.s32 8, %v381_v2  ;;  %v383_v30 = vadd.s32 16, %v381_v2  ;;  %v384_v57 = vadd.s32 24, %v381_v2 }
  0xc7   :  { %493 = vmatmul.msk.f32.vlgmr.msra.gmra.mxu3 %vm74_vm0, %v198_v41  ;;  %v391_v26 = vsel %vm387_vm4, -1.0, %v662_v49 }
  0xc8   :  { %vm388_vm5 = vcmp.eq.s32.totalorder %v382_v43, %v386_v42  ;;  %vm389_vm6 = vcmp.eq.s32.totalorder %v383_v30, %v386_v42  ;;  %vm390_vm7 = vcmp.eq.s32.totalorder %v384_v57, %v386_v42 }
  0xc9   :  { %v392_v50 = vsel %vm388_vm5, -1.0, %v662_v49  ;;  %v393_v52 = vsel %vm389_vm6, -1.0, %v662_v49  ;;  %v394_v5 = vsel %vm390_vm7, -1.0, %v662_v49 }
 0x140   :  { %v368_v44 = vpop.f32.mrf.mxu0  ;;  %v371_v45 = vpop.f32.mrf.mxu1 }
 0x141   :  { %v494_v46 = vadd.f32 -0.5, %v368_v44  ;;  %v495_v47 = vadd.f32 -0.5, %v371_v45 }
 0x143   :  { %v399_v53 = vmul.f32 2.0, %v494_v46  ;;  %v400_v55 = vmul.f32 2.0, %v495_v47  ;;  %v446_v46 = vld [vmem:[#allocation7 + $0x18] sm:$0xff] }
 0x145   :  { %v403_v56 = vmul.f32 %v399_v53, %v391_v26  ;;  %v404_v11 = vmul.f32 %v400_v55, %v392_v50 }
 0x147   :  { %v411_v48 = vand.u32 2147483647, %v403_v56  ;;  %v412_v31 = vand.u32 2147483647, %v404_v11  ;;  %v374_v58 = vpop.f32.mrf.mxu2  ;;  %v407_v28 = vmax.f32 %v403_v56, 0.0  ;;  %v408_v35 = vmax.f32 %v404_v11, 0.0 }
 0x148   :  { %v496_v60 = vadd.f32 -0.5, %v374_v58 }
 0x149   :  { %v415_v61 = vsub.f32 0.0, %v411_v48  ;;  %v416_v62 = vsub.f32 0.0, %v412_v31 }
 0x14a   :  { %v401_v34 = vmul.f32 2.0, %v496_v60  ;;  %v377_v63 = vpop.f32.mrf.mxu3 }
 0x14b   :  { %v419_v3 = vmul.f32 1.442695, %v415_v61  ;;  %v421_v6 = vmul.f32 1.442695, %v416_v62  ;;  %v497_v4 = vadd.f32 -0.5, %v377_v63 }
 0x14c   :  { %v405_v1 = vmul.f32 %v401_v34, %v393_v52 }
 0x14d   :  { %551 = vpow2.f32 %v419_v3  ;;  %v402_v8 = vmul.f32 2.0, %v497_v4 }
 0x14e   :  { %553 = vpow2.f32 %v421_v6  ;;  %v413_v9 = vand.u32 2147483647, %v405_v1  ;;  %v409_v18 = vmax.f32 %v405_v1, 0.0 }
 0x14f   :  { %v406_v10 = vmul.f32 %v402_v8, %v394_v5 }
 0x150   :  { %v417_v12 = vsub.f32 0.0, %v413_v9 }
 0x151   :  { %v414_v14 = vand.u32 2147483647, %v406_v10  ;;  %v410_v43 = vmax.f32 %v406_v10, 0.0 }
 0x152   :  { %v423_v15 = vmul.f32 1.442695, %v417_v12 }
 0x153   :  { %v552_v13 = vpop.eup %551  ;;  %v418_v17 = vsub.f32 0.0, %v414_v14 }
 0x154   :  { %v554_v21 = vpop.eup %553  ;;  %v427_v16 = vadd.f32 1.0, %v552_v13  ;;  %555 = vpow2.f32 %v423_v15 }
 0x155   :  { %v428_v7 = vadd.f32 1.0, %v554_v21  ;;  %v425_v22 = vmul.f32 1.442695, %v418_v17 }
 0x156   :  { %557 = vlog2.f32 %v427_v16 }
 0x157   :  { %559 = vlog2.f32 %v428_v7 }
 0x158   :  { %561 = vpow2.f32 %v425_v22 }
 0x15a   :  { %v556_v51 = vpop.eup %555 }
 0x15b   :  { %v429_v23 = vadd.f32 1.0, %v556_v51 }
 0x15c   :  { %v558_v24 = vpop.eup %557 }
 0x15d   :  { %v560_v27 = vpop.eup %559  ;;  %v432_v29 = vmul.f32 0.6931472, %v558_v24  ;;  %563 = vlog2.f32 %v429_v23 }
 0x15e   :  { %v562_v33 = vpop.eup %561  ;;  %v434_v36 = vmul.f32 0.6931472, %v560_v27 }
 0x15f   :  { %v439_v39 = vadd.f32 %v432_v29, %v407_v28  ;;  %v430_v38 = vadd.f32 1.0, %v562_v33 }
 0x160   :  { %v440_v54 = vadd.f32 %v434_v36, %v408_v35 }
 0x161   :  { %565 = vlog2.f32 %v430_v38  ;;  %v447_v0 = vmul.f32 %v443_v32, %v439_v39 }
 0x162   :  { %v448_v40 = vmul.f32 %v444_v37, %v440_v54 }
 0x163   :  { %v564_v20 = vpop.eup %563  ;;  %v451_v59 = vsel %vm74_vm0, %v447_v0, 0.0 }
 0x164   :  { %v436_v25 = vmul.f32 0.6931472, %v564_v20  ;;  %v452_v2 = vsel %vm74_vm0, %v448_v40, 0.0 }
 0x165   :  { %v453_v47 = vadd.f32 %v452_v2, %v451_v59 }
 0x166   :  { %v441_v41 = vadd.f32 %v436_v25, %v409_v18 }
 0x167   :  { %v566_v42 = vpop.eup %565 }
 0x168   :  { %v438_v44 = vmul.f32 0.6931472, %v566_v42  ;;  %v449_v45 = vmul.f32 %v445_v19, %v441_v41 }
 0x16a   :  { %v442_v49 = vadd.f32 %v438_v44, %v410_v43  ;;  %v454_v26 = vsel %vm74_vm0, %v449_v45, 0.0 }
 0x16b   :  { %v455_v50 = vadd.f32 %v454_v26, %v453_v47 }
 0x16c   :  { %v450_v30 = vmul.f32 %v446_v46, %v442_v49 }
 0x16e   :  { %v456_v53 = vsel %vm74_vm0, %v450_v30, 0.0 }
 0x16f   :  { %v457_v55 = vadd.f32 %v456_v53, %v455_v50 }
 0x171   :  { %458 = vadd.xlane.f32.xlu2 %v457_v55 }
 0x1e4   :  { %v459_v56 = vpop.xlane.xlu2 %458 }
 0x1e5   :  { %v460_v11 = vrot.slane %v459_v56, 4 }
 0x1e7   :  { %v461_v57 = vadd.f32 %v460_v11, %v459_v56 }
 0x1e9   :  { %v462_v48 = vrot.slane %v461_v57, 2 }
 0x1eb   :  { %v463_v31 = vadd.f32 %v462_v48, %v461_v57 }
 0x1ed   :  { %v464_v58 = vrot.slane %v463_v31, 1 }
 0x1ef   :  { %v465_v60 = vadd.f32 %v464_v58, %v463_v31 }
 0x1f1   :  { %510 = vpush %v465_v60 }
 0x222   :  { %s511_s29 = spop %510 }
 0x223   :  { %468 = sst [smem:[#allocation8]] %s511_s29 }
 0x224   :  { %477 = dma.smem_to_hbm %s663_s30, 16, %s475_s28, [#allocation4]  }
 0x225   :  { %655 = dma.done.wait [#allocation4], 16  }
 0x226   :  { %656 = vsyncadd [#allocation4], 4294967280 }
 0x227   :  { %482 = sfence }
 0x228   :  { %483 = vsyncpa [#allocation3], 1 }
 0x229   :  { %484 = vsyncpa [#allocation6], 1 }
 0x22a   :  { %485 = vsyncpa [#allocation4], 1 }

</bundles_post_ra>
